<compile_context>
chip_gen: v6e
topology: v6e:2x2x1
jax: 0.10.0
libtpu: 0.0.40
codegen_flags: <defaults>
</compile_context>

<pallas_src>
import functools
import math

import jax
import jax.numpy as jnp
from jax.experimental import pallas as pl
from jax.experimental.pallas import tpu as pltpu


def _layernorm_kernel(x_ref, w_ref, b_ref, o_ref, *, eps, hidden):
    # (1, H) params are pre-cast to f32 on the host and DMA'd once (constant
    # index_map); no per-step cast work here.
    w = w_ref[...]                                       # (1, H) f32
    b = b_ref[...]                                       # (1, H) f32

    x = x_ref[...].astype(jnp.float32)                   # (ROW_BLK, H)
    # Row statistics, centered form (robust when |mean| >> std).
    mean = jnp.mean(x, axis=-1, keepdims=True)           # (ROW_BLK, 1)
    d = x - mean
    # Unbiased variance (Bessel's correction) to match torch.std default.
    var = jnp.sum(d * d, axis=-1, keepdims=True) * (1.0 / (hidden - 1))
    denom = jnp.sqrt(var) + eps                          # eps on std, per module

    # Per-row reciprocal: EUP approx (separate VLIW slot) + one Newton-Raphson
    # step to recover f32 accuracy; the full-tile op is then a multiply.
    inv = pl.reciprocal(denom, approx=True)              # (ROW_BLK, 1)
    inv = inv * (2.0 - denom * inv)

    if o_ref.dtype == jnp.bfloat16:
        # v6e/v7x have packed bf16 VALU: do the last two full-tile ops in bf16
        # (result is rounded to bf16 for the store anyway) to cut VALU work on
        # HBM-fast v7x.
        o_ref[...] = ((d * inv).astype(jnp.bfloat16) * w.astype(jnp.bfloat16)
                      + b.astype(jnp.bfloat16))
    else:
        o_ref[...] = (d * inv * w + b).astype(o_ref.dtype)


def _round_up(n, m):
    return ((n + m - 1) // m) * m


def _tpu_vmem_and_cores():
    """Return (tile budget bytes, scoped vmem limit bytes, # TensorCores)."""
    phys = 128 * 1024 * 1024            # v5e/v6e per-TensorCore VMEM
    cores = 1
    kind = ""
    try:
        kind = jax.devices()[0].device_kind.lower()
    except Exception:
        pass
    try:
        info = pltpu.get_tpu_info()
        v = int(getattr(info, "vmem_capacity_bytes", 0) or 0)
        if v:
            phys = v
        c = int(getattr(info, "num_cores", 0) or 0)
        if c:
            cores = c
    except Exception:
        pass
    # v7x: 64 MiB per TensorCore, 2 TensorCores per chip.
    if ("7" in kind) or phys <= 64 * 1024 * 1024:
        phys = min(phys, 64 * 1024 * 1024)
        cores = max(cores, 2)
    limit = min((phys * 5) // 8, 96 * 1024 * 1024)   # 40 MiB (v7x) / 80 MiB (v5e/v6e)
    budget = (limit * 3) // 4                        # headroom for regalloc / params
    return budget, limit, cores


def _pick_row_block(rows, hidden, itemsize, vmem_budget_bytes, num_cores):
    """Largest multiple-of-8 row tile whose full VMEM footprint fits the budget.

    Footprint per row ~= 2 double-buffered input rows + 2 double-buffered output
    rows (HBM dtype) + ~3 full-tile f32 intermediates.
    """
    bytes_per_row = max(hidden * (4 * itemsize + 3 * 4), 1)
    rb = max(8, ((vmem_budget_bytes // bytes_per_row) // 8) * 8)
    rb = min(rb, _round_up(rows, 8))                 # never bigger than the problem

    if num_cores > 1 and rows > 8:
        # Megacore load balance: grid length a multiple of num_cores; prefer
        # 2*num_cores steps when each input buffer stays >= ~4 MiB (past the
        # measured HBM-roofline knee).
        knee_rows = _round_up(max((4 * 1024 * 1024) // max(hidden * itemsize, 1), 8), 8)
        steps = _round_up(pl.cdiv(rows, rb), num_cores)
        finer = _round_up(steps, 2 * num_cores)
        if _round_up(pl.cdiv(rows, finer), 8) >= knee_rows:
            steps = finer
        rb = min(rb, _round_up(pl.cdiv(rows, steps), 8))
    return rb


def layer_norm(x, weight, bias, eps):
    """x: (..., hidden); weight, bias: (hidden,). Normalizes over the last axis."""
    orig_shape = x.shape
    hidden = orig_shape[-1]
    if hidden < 2:
        raise ValueError("hidden must be >= 2 (torch.std uses N-1).")

    rows = int(math.prod(orig_shape[:-1])) if len(orig_shape) > 1 else 1
    x2d = x.reshape(rows, hidden)                    # metadata-only reshape
    # Pre-cast params once on the host; the (1, H) tiles stay resident in VMEM.
    w2d = weight.astype(jnp.float32).reshape(1, hidden)
    b2d = bias.astype(jnp.float32).reshape(1, hidden)

    vmem_budget, vmem_limit, num_cores = _tpu_vmem_and_cores()
    row_block = _pick_row_block(rows, hidden, jnp.dtype(x.dtype).itemsize,
                                vmem_budget, num_cores)
    grid = (pl.cdiv(rows, row_block),)               # partial last block is masked

    # TODO(synk): hidden % 128 != 0 leaves stores lane-masked; host-side zero
    # padding to 128 was evaluated but rejected because the extra pad/slice HBM
    # passes cost more than the masked stores for this bandwidth-bound kernel.

    kernel = functools.partial(_layernorm_kernel, eps=float(eps), hidden=hidden)

    out2d = pl.pallas_call(
        kernel,
        out_shape=jax.ShapeDtypeStruct((rows, hidden), x.dtype),
        grid_spec=pltpu.PrefetchScalarGridSpec(
            num_scalar_prefetch=0,
            grid=grid,
            in_specs=[
                pl.BlockSpec((row_block, hidden), lambda i: (i, 0)),
                pl.BlockSpec((1, hidden), lambda i: (0, 0)),
                pl.BlockSpec((1, hidden), lambda i: (0, 0)),
            ],
            out_specs=pl.BlockSpec((row_block, hidden), lambda i: (i, 0)),
        ),
        compiler_params=pltpu.CompilerParams(
            dimension_semantics=("parallel",),       # shard row tiles across TCs
            vmem_limit_bytes=int(vmem_limit),
        ),
    )(x2d, w2d, b2d)

    return out2d.reshape(orig_shape)


if __name__ == "__main__":
    eps = 1e-6
    batch, seq, hidden = 2, 8, 32

    key = jax.random.PRNGKey(0)
    x = jax.random.normal(key, (batch, seq, hidden), dtype=jnp.float32)

    # deterministic parameter init, matching the module's __init__
    weight = jnp.ones((hidden,), dtype=jnp.float32)
    bias = jnp.zeros((hidden,), dtype=jnp.float32)

    out = layer_norm(x, weight, bias, eps)
    jax.block_until_ready(out)

    # reference check (pure JAX, same semantics as the PyTorch forward)
    mean = jnp.mean(x, axis=-1, keepdims=True)
    std = jnp.sqrt(jnp.sum((x - mean) ** 2, axis=-1, keepdims=True) / (hidden - 1))
    ref = weight * (x - mean) / (std + eps) + bias
    assert jnp.allclose(out, ref, atol=1e-5, rtol=1e-5), "mismatch vs reference"

    print("KERNEL_OK")
</pallas_src>

<mosaic_0001>
module attributes {stable_mosaic.version = 11 : i64} {
  func.func @_layernorm_kernel(%arg0: i32, %arg1: memref<16x32xf32, #tpu.memory_space<vmem>>, %arg2: memref<1x32xf32, #tpu.memory_space<vmem>>, %arg3: memref<1x32xf32, #tpu.memory_space<vmem>>, %arg4: memref<16x32xf32, #tpu.memory_space<vmem>>) attributes {dimension_semantics = [#tpu.dimension_semantics<parallel>], iteration_bounds = array<i64: 1>, scalar_prefetch = 0 : i64, scratch_operands = 0 : i64, tpu.core_type = #tpu.core_type<tc>, window_params = [{transform_indices = @transform_0, window_bounds = array<i64: 16, 32>}, {pipeline_mode = #tpu.pipeline_mode<synchronous>, transform_indices = @transform_1, window_bounds = array<i64: 1, 32>}, {pipeline_mode = #tpu.pipeline_mode<synchronous>, transform_indices = @transform_2, window_bounds = array<i64: 1, 32>}, {transform_indices = @transform_3, window_bounds = array<i64: 16, 32>}]} {
    %c0 = arith.constant 0 : index
    %c0_0 = arith.constant 0 : index
    %0 = vector.load %arg2[%c0, %c0_0] : memref<1x32xf32, #tpu.memory_space<vmem>>, vector<1x32xf32>
    %c0_1 = arith.constant 0 : index
    %c0_2 = arith.constant 0 : index
    %1 = vector.load %arg3[%c0_1, %c0_2] : memref<1x32xf32, #tpu.memory_space<vmem>>, vector<1x32xf32>
    %c0_3 = arith.constant 0 : index
    %c0_4 = arith.constant 0 : index
    %2 = vector.load %arg1[%c0_3, %c0_4] : memref<16x32xf32, #tpu.memory_space<vmem>>, vector<16x32xf32>
    %cst = arith.constant dense<0.000000e+00> : vector<16xf32>
    %3 = vector.multi_reduction <add>, %2, %cst [1] : vector<16x32xf32> to vector<16xf32>
    %4 = vector.shape_cast %3 : vector<16xf32> to vector<16x1xf32>
    %cst_5 = arith.constant 3.200000e+01 : f32
    %5 = vector.broadcast %cst_5 : f32 to vector<16x1xf32>
    %6 = arith.divf %4, %5 : vector<16x1xf32>
    %7 = vector.broadcast %6 : vector<16x1xf32> to vector<16x32xf32>
    %8 = arith.subf %2, %7 : vector<16x32xf32>
    %9 = arith.mulf %8, %8 : vector<16x32xf32>
    %cst_6 = arith.constant dense<0.000000e+00> : vector<16xf32>
    %10 = vector.multi_reduction <add>, %9, %cst_6 [1] : vector<16x32xf32> to vector<16xf32>
    %11 = vector.shape_cast %10 : vector<16xf32> to vector<16x1xf32>
    %cst_7 = arith.constant 0.0322580636 : f32
    %12 = vector.broadcast %cst_7 : f32 to vector<16x1xf32>
    %13 = arith.mulf %11, %12 : vector<16x1xf32>
    %14 = math.sqrt %13 : vector<16x1xf32>
    %cst_8 = arith.constant 9.99999997E-7 : f32
    %15 = vector.broadcast %cst_8 : f32 to vector<16x1xf32>
    %16 = arith.addf %14, %15 : vector<16x1xf32>
    %17 = tpu.reciprocal %16 {approx = true} : vector<16x1xf32> -> vector<16x1xf32>
    %18 = arith.mulf %16, %17 : vector<16x1xf32>
    %cst_9 = arith.constant 2.000000e+00 : f32
    %19 = vector.broadcast %cst_9 : f32 to vector<16x1xf32>
    %20 = arith.subf %19, %18 : vector<16x1xf32>
    %21 = arith.mulf %17, %20 : vector<16x1xf32>
    %22 = vector.broadcast %21 : vector<16x1xf32> to vector<16x32xf32>
    %23 = arith.mulf %8, %22 : vector<16x32xf32>
    %24 = vector.broadcast %0 : vector<1x32xf32> to vector<16x32xf32>
    %25 = arith.mulf %23, %24 : vector<16x32xf32>
    %26 = vector.broadcast %1 : vector<1x32xf32> to vector<16x32xf32>
    %27 = arith.addf %25, %26 : vector<16x32xf32>
    %c0_10 = arith.constant 0 : index
    %c0_11 = arith.constant 0 : index
    %28 = vector.load %arg4[%c0_10, %c0_11] : memref<16x32xf32, #tpu.memory_space<vmem>>, vector<16x32xf32>
    tpu.vector_store %arg4[%c0_10, %c0_11], %27 {strides = array<i32>} : memref<16x32xf32, #tpu.memory_space<vmem>>, vector<16x32xf32>,
    return
  }
  func.func @transform_0(%arg0: i32) -> (i32, i32) {
    %c0_i32 = arith.constant 0 : i32
    %c0_i32_0 = arith.constant 0 : i32
    return %arg0, %c0_i32 : i32, i32
  }
  func.func @transform_1(%arg0: i32) -> (i32, i32) {
    %c0_i32 = arith.constant 0 : i32
    %c0_i32_0 = arith.constant 0 : i32
    %c0_i32_1 = arith.constant 0 : i32
    return %c0_i32, %c0_i32_0 : i32, i32
  }
  func.func @transform_2(%arg0: i32) -> (i32, i32) {
    %c0_i32 = arith.constant 0 : i32
    %c0_i32_0 = arith.constant 0 : i32
    %c0_i32_1 = arith.constant 0 : i32
    return %c0_i32, %c0_i32_0 : i32, i32
  }
  func.func @transform_3(%arg0: i32) -> (i32, i32) {
    %c0_i32 = arith.constant 0 : i32
    %c0_i32_0 = arith.constant 0 : i32
    return %arg0, %c0_i32 : i32, i32
  }
}

</mosaic_0001>

<bundles_post_ra>
// kernel: tpu_custom_call.1
= control target key start
LH: loop header
LB: loop body
LE: loop exit
PB: predicated region body
PF: predicated region fallthrough
CT: control target
= control target key end

     0   :  { %8 = vsyncpa [#allocation3], 0  ;;  %s222_s0 = inlined_call_operand.hbm [shape: f32[16,32], index: 0, kind: input, shape index: {}]   ;;  %s223_s1 = inlined_call_operand.vmem [shape: f32[1,32], index: 1, kind: input, shape index: {}]   ;;  %s224_s2 = inlined_call_operand.vmem [shape: f32[1,32], index: 2, kind: input, shape index: {}]   ;;  %s225_s3 = inlined_call_operand.hbm [shape: f32[16,32], index: 3, kind: output, shape index: {}]  }
   0x1   :  { %9 = vsyncpa [#allocation4], 0  ;;  %s174_s12 = smov [#allocation2]  }
   0x2   :  { %s15_s13 = sshll.u32 %s174_s12, 4  ;;  %s16_s13 = int_to_ptr.vmem [resolvable:$true] %s15_s13 }
   0x3   :  { %s138_s14 = scalar_lea.vmem %s16_s13, 256  ;;  %p143_p1 = scmp.lt.s32.totalorder %s16_s13, %s16_s13 }
   0x4   :  { %p139_p0 = scmp.ne.s32.totalorder %s16_s13, %s138_s14  ;;  %p144_p2 = scmp.lt.s32.totalorder %s138_s14, %s138_s14 }
   0x6   :  { %p145_p3 = por %p144_p2, %p143_p1 }
   0x8   :  { %p146_p4 = pnand %p145_p3, %p139_p0 }
   0xa   :  { %149 = shalt.err (!%p146_p4)
}
   0xb   :  { %s175_s15 = smov 128   ;;  %s176_s16 = smov 8  }
   0xc   :  { %21 = dma.hbm_to_vmem [thread:$0]  %s222_s0, 256, %s16_s13, [#allocation3], %s175_s15, %s175_s15, %s176_s16  }
   0xd   :  { %170 = dma.done.wait [#allocation3], 256  }
   0xe   :  { %171 = vsyncadd [#allocation3], 4294967040  ;;  %vm33_vm0 = vcmask 261120   ;;  %v31_v0 = vld [vmem:[#allocation2] sm:$0xff]  ;;  %v32_v1 = vld [vmem:[#allocation2 + $0x8] sm:$0xff]  ;;  %s177_s22 = smov [#allocation5]  }
   0xf   :  { %v34_v2 = vsel %vm33_vm0, %v31_v0, 0.0  ;;  %v37_v3 = vsel %vm33_vm0, %v32_v1, 0.0  ;;  %v116_v36 = vld [vmem:[%s223_s1] ss:$0 sm:$0xff]  ;;  %s104_s23 = sshll.u32 %s177_s22, 4  ;;  %s105_s23 = int_to_ptr.vmem [resolvable:$true] %s104_s23 }
  0x10   :  { %35 = vadd.xlane.f32.xlu0 %v34_v2  ;;  %v117_v39 = vld [vmem:[%s224_s2] ss:$0 sm:$0xff]  ;;  %s150_s1 = scalar_lea.vmem %s105_s23, 256  ;;  %p155_p6 = scmp.lt.s32.totalorder %s105_s23, %s105_s23 }
  0x11   :  { %p151_p5 = scmp.ne.s32.totalorder %s105_s23, %s150_s1  ;;  %p156_p7 = scmp.lt.s32.totalorder %s150_s1, %s150_s1 }
  0x13   :  { %p157_p8 = por %p156_p7, %p155_p6 }
  0x14   :  { %38 = vadd.xlane.f32.xlu0 %v37_v3 }
  0x15   :  { %p158_p9 = pnand %p157_p8, %p151_p5 }
  0x99   :  { %v36_v4 = vpop.xlane.xlu0 %35 }
  0x9a   :  { %v41_v5 = vmul.f32 0.03125, %v36_v4 }
  0x9c   :  { %v43_v6 = vsub.f32 %v31_v0, %v41_v5 }
  0x9d   :  { %v39_v7 = vpop.xlane.xlu0 %38 }
  0x9e   :  { %v42_v8 = vmul.f32 0.03125, %v39_v7  ;;  %v45_v9 = vmul.f32 %v43_v6, %v43_v6 }
  0xa0   :  { %v44_v10 = vsub.f32 %v32_v1, %v42_v8  ;;  %v47_v11 = vsel %vm33_vm0, %v45_v9, 0.0 }
  0xa1   :  { %48 = vadd.xlane.f32.xlu1 %v47_v11 }
  0xa2   :  { %v46_v12 = vmul.f32 %v44_v10, %v44_v10 }
  0xa4   :  { %v50_v13 = vsel %vm33_vm0, %v46_v12, 0.0 }
  0xa5   :  { %51 = vadd.xlane.f32.xlu1 %v50_v13 }
 0x12a   :  { %v49_v14 = vpop.xlane.xlu1 %48 }
 0x12b   :  { %v53_v15 = vmul.f32 0.032258064, %v49_v14 }
 0x12d   :  { %122 = vrsqrt.f32 %v53_v15  ;;  %vm57_vm1 = vcmp.eq.f32.partialorder %v53_v15, inf  ;;  %v60_v20 = vand.u32 2147483648, %v53_v15  ;;  %vm59_vm2 = vcmp.eq.f32.partialorder %v53_v15, 0.0 }
 0x12e   :  { %v52_v16 = vpop.xlane.xlu1 %51 }
 0x12f   :  { %v54_v17 = vmul.f32 0.032258064, %v52_v16 }
 0x131   :  { %124 = vrsqrt.f32 %v54_v17  ;;  %vm64_vm3 = vcmp.eq.f32.partialorder %v54_v17, inf  ;;  %v67_v26 = vand.u32 2147483648, %v54_v17  ;;  %vm66_vm4 = vcmp.eq.f32.partialorder %v54_v17, 0.0 }
 0x13a   :  { %v123_v18 = vpop.eup %122 }
 0x13b   :  { %v56_v19 = vmul.f32 %v123_v18, %v53_v15 }
 0x13d   :  { %v58_v21 = vsel %vm57_vm1, %v53_v15, %v56_v19 }
 0x13e   :  { %v125_v22 = vpop.eup %124  ;;  %v61_v23 = vsel %vm59_vm2, %v60_v20, %v58_v21 }
 0x13f   :  { %v63_v24 = vmul.f32 %v125_v22, %v54_v17  ;;  %v69_v25 = vadd.f32 1e-06, %v61_v23 }
 0x141   :  { %v65_v27 = vsel %vm64_vm3, %v54_v17, %v63_v24  ;;  %126 = vrcp.f32 %v69_v25 }
 0x142   :  { %v68_v28 = vsel %vm66_vm4, %v67_v26, %v65_v27 }
 0x143   :  { %v70_v29 = vadd.f32 1e-06, %v68_v28 }
 0x145   :  { %128 = vrcp.f32 %v70_v29 }
 0x14e   :  { %v127_v30 = vpop.eup %126 }
 0x14f   :  { %v73_v31 = vmul.f32 %v127_v30, %v69_v25 }
 0x151   :  { %v75_v32 = vsub.f32 2.0, %v73_v31 }
 0x152   :  { %v129_v33 = vpop.eup %128 }
 0x153   :  { %v74_v34 = vmul.f32 %v129_v33, %v70_v29  ;;  %v77_v35 = vmul.f32 %v127_v30, %v75_v32 }
 0x155   :  { %v76_v37 = vsub.f32 2.0, %v74_v34  ;;  %v79_v38 = vmul.f32 %v77_v35, %v43_v6 }
 0x157   :  { %v78_v40 = vmul.f32 %v129_v33, %v76_v37  ;;  %v87_v41 = vmul.f32 %v116_v36, %v79_v38 }
 0x159   :  { %v80_v42 = vmul.f32 %v78_v40, %v44_v10  ;;  %v95_v43 = vadd.f32 %v117_v39, %v87_v41 }
 0x15b   :  { %v88_v44 = vmul.f32 %v116_v36, %v80_v42  ;;  %97 = vst.msk [vmem:[#allocation5] sm:$0xff] %vm33_vm0, %v95_v43 }
 0x15d   :  { %v96_v45 = vadd.f32 %v117_v39, %v88_v44 }
 0x15f   :  { %98 = vst.msk [vmem:[#allocation5 + $0x8] sm:$0xff] %vm33_vm0, %v96_v45 }
 0x160   :  { %161 = shalt.err (!%p158_p9)
}
 0x161   :  { %110 = dma.vmem_to_hbm [thread:$0]  %s105_s23, 256, %s225_s3, [#allocation4], %s175_s15, %s175_s15, %s176_s16  }
 0x162   :  { %172 = dma.done.wait [#allocation4], 256  }
 0x163   :  { %173 = vsyncadd [#allocation4], 4294967040 }
 0x164   :  { %114 = vsyncpa [#allocation3], 1 }
 0x165   :  { %115 = vsyncpa [#allocation4], 1 }

</bundles_post_ra>
